<compile_context>
chip_gen: v7x
topology: tpu7x:2x2x1
jax: 0.10.0
libtpu: 0.0.40
codegen_flags: <defaults>
</compile_context>

<pallas_src>
import functools

import jax
import jax.numpy as jnp
from jax.experimental import pallas as pl
from jax.experimental.pallas import tpu as pltpu

# ---- static configuration (mirrors the PyTorch module __init__) -------------
BOND_FEATURE_DIMS = (5, 6, 2)            # ogb get_bond_feature_dims()
NUM_BOND_FEATS = len(BOND_FEATURE_DIMS)
VMAX = 8                                 # padded per-feature vocab stride in fused table
DIM = 32                                 # hidden dim
N_CLASS = 10                             # reaction classes
NUM_IDS = NUM_BOND_FEATS + 1             # 3 bond-feature ids + 1 rxn-class id per edge
K_PAD = 128                              # per-edge one-hot width (= MXU K on v5e/v6e)
RXN_OFFSET = NUM_BOND_FEATS * VMAX       # row offset of rxn-class rows in fused table
GROUP = K_PAD // DIM                     # 4 edges per lane-dense output row
K_BD = GROUP * K_PAD                     # 512: block-diagonal K
N_BD = GROUP * DIM                       # 128: lane-dense N
MAX_GROUP_TILE = 1024                    # 1024 groups = 4096 edges per grid step
VMEM_LIMIT_BYTES = 32 * 1024 * 1024      # explicit; ~4.5 MiB actually used at max tile


def _round_up(x, m):
    return ((x + m - 1) // m) * m


# ---- kernel ------------------------------------------------------------------
def _fused_encoder_kernel(ids_ref, tab_ref, out_ref):
    """ids_ref: (tg, 16) int32; tab_ref: (512, 128) f32; out_ref: (tg, 128) f32.

    Each row of ids holds 4 edges x 4 ids (fused-table row offsets pre-baked).
    Edge slot j's one-hot occupies lanes [j*128, (j+1)*128) of the (tg, 512)
    operand; the block-diagonal table routes it to output lanes [j*32, (j+1)*32).
    """
    tg = ids_ref.shape[0]
    ids = ids_ref[...]
    iota = jax.lax.broadcasted_iota(jnp.int32, (tg, K_PAD), 1)
    subs = []
    for j in range(GROUP):                           # edge slot within group of 4
        base = j * NUM_IDS
        m = ids[:, base:base + 1] == iota
        for c in range(1, NUM_IDS):                  # disjoint id ranges -> OR == sum
            m = jnp.logical_or(m, ids[:, base + c:base + c + 1] == iota)
        subs.append(m.astype(jnp.float32))           # single cast per slot
    onehot = jnp.concatenate(subs, axis=-1)          # (tg, 512)
    # Single MXU pass: all 4 embedding lookups + Linear + bias folded into tab_ref.
    out_ref[...] = jnp.dot(onehot, tab_ref[...],
                           preferred_element_type=jnp.float32).astype(out_ref.dtype)


# ---- parameter folding (one-time, XLA side) ----------------------------------
def build_fused_params(bond_tables, rxn_table, w_full, bias):
    """Fold Linear(2*dim, dim) + bias into one block-diagonal (512, 128) table.

    PyTorch: y = cat([rxn_emb, bond_emb], -1) @ W.T + b
           = rxn_emb @ W[:, :DIM].T + bond_emb @ W[:, DIM:].T + b
    The bias is added to every rxn-class row (exactly one is selected per edge).
    """
    w_rxn = w_full[:, :DIM].T            # acts on the rxn_class_emb half
    w_bond = w_full[:, DIM:].T           # acts on the bond-encoder half
    fused = jnp.zeros((K_PAD, DIM), jnp.float32)
    for f, tab in enumerate(bond_tables):
        fused = fused.at[f * VMAX:f * VMAX + tab.shape[0]].set(tab @ w_bond)
    fused = fused.at[RXN_OFFSET:RXN_OFFSET + rxn_table.shape[0]].set(
        rxn_table @ w_rxn + bias[None, :])
    # Block-diagonal replication: edge slot j reads rows [j*128, (j+1)*128) and
    # writes output lanes [j*32, (j+1)*32)  ->  lane-dense (., 128) output.
    bd = jnp.zeros((K_BD, N_BD), jnp.float32)
    for j in range(GROUP):
        bd = bd.at[j * K_PAD:(j + 1) * K_PAD, j * DIM:(j + 1) * DIM].set(fused)
    return bd


# ---- wrapper -----------------------------------------------------------------
@functools.partial(jax.jit, static_argnames=("max_group_tile",))
def sparse_bond_encoder(edge_feat, rxn_class, fused_bd_table,
                        max_group_tile=MAX_GROUP_TILE):
    """edge_feat: (E, 3) int, rxn_class: (E, 1) int -> (E, DIM) float32."""
    E = edge_feat.shape[0]
    G = pl.cdiv(E, GROUP)                            # groups of 4 edges

    # One merged id stream with fused-table row offsets baked in: (E, 4) -> (G, 16).
    # NOTE: out-of-range ids (bond feat >= 8, rxn >= 10, negatives) silently select
    # a zero table row instead of raising like torch.nn.Embedding.
    feat_offsets = (jnp.arange(NUM_BOND_FEATS, dtype=jnp.int32) * VMAX)[None, :]
    ids = jnp.concatenate(
        [edge_feat.astype(jnp.int32) + feat_offsets,
         rxn_class.astype(jnp.int32) + RXN_OFFSET], axis=1)
    pad = G * GROUP - E
    if pad:  # <=3 rows; padded ids hit the all-zero row 127 of the fused table
        ids = jnp.pad(ids, ((0, pad), (0, 0)), constant_values=K_PAD - 1)
    ids_g = ids.reshape(G, GROUP * NUM_IDS)          # (G, 16)

    # Large tile to amortize ~0.35us/step grid overhead; keep >=2 grid steps when
    # possible so the "parallel" axis can shard across v7x's two TensorCores.
    # TODO(synk): try pltpu.CORE_PARALLEL / explicit core_map on v7x for a
    # guaranteed 2-TC split of the edge axis.
    tg = min(max_group_tile, max(8, _round_up(pl.cdiv(G, 2), 8)))

    out = pl.pallas_call(
        _fused_encoder_kernel,
        out_shape=jax.ShapeDtypeStruct((G, N_BD), jnp.float32),
        grid_spec=pltpu.PrefetchScalarGridSpec(
            num_scalar_prefetch=0,
            grid=(pl.cdiv(G, tg),),                  # partial last block: masked store
            in_specs=[
                pl.BlockSpec((tg, GROUP * NUM_IDS), lambda i: (i, 0)),
                pl.BlockSpec((K_BD, N_BD), lambda i: (0, 0)),
            ],
            out_specs=pl.BlockSpec((tg, N_BD), lambda i: (i, 0)),
        ),
        compiler_params=pltpu.CompilerParams(
            dimension_semantics=("parallel",),
            vmem_limit_bytes=VMEM_LIMIT_BYTES),
    )(ids_g, fused_bd_table)

    # (G, 128) f32 row-major is bit-identical to (4G, 32): free reshape.
    out = out.reshape(G * GROUP, DIM)
    return out if pad == 0 else out[:E]
    # TODO(synk): bf16 table/one-hot/output variants if downstream tolerates ~1e-3.
    # TODO(synk): n_class=None branch (BondEncoder only, no Linear) not implemented.


# ---- pure-JAX reference (original, un-fused math) ----------------------------
def _reference(edge_feat, rxn_class, bond_tables, rxn_table, w_full, bias):
    bond_emb = jnp.zeros((edge_feat.shape[0], DIM), jnp.float32)
    for f in range(NUM_BOND_FEATS):
        bond_emb = bond_emb + bond_tables[f][edge_feat[:, f]]
    rxn_emb = rxn_table[rxn_class[:, 0]]
    x = jnp.concatenate([rxn_emb, bond_emb], axis=-1)
    return x @ w_full.T + bias


if __name__ == "__main__":
    key = jax.random.PRNGKey(0)
    k_tab, k_rxn_tab, k_w, k_b, k_ef, k_rc = jax.random.split(key, 6)

    # --- deterministic parameter init (synthetic, mirrors module shapes) -----
    tab_keys = jax.random.split(k_tab, NUM_BOND_FEATS)
    bond_tables = [jax.random.normal(tab_keys[f], (v, DIM), jnp.float32)
                   for f, v in enumerate(BOND_FEATURE_DIMS)]
    rxn_table = jax.random.normal(k_rxn_tab, (N_CLASS, DIM), jnp.float32)
    w_full = jax.random.normal(k_w, (DIM, 2 * DIM), jnp.float32) * 0.1
    bias = jax.random.normal(k_b, (DIM,), jnp.float32) * 0.1

    fused_bd = build_fused_params(bond_tables, rxn_table, w_full, bias)

    def make_inputs(E, salt):
        ef = jnp.stack(
            [jax.random.randint(jax.random.fold_in(k_ef, salt * 10 + f), (E,),
                                0, BOND_FEATURE_DIMS[f])
             for f in range(NUM_BOND_FEATS)], axis=-1).astype(jnp.int32)   # (E, 3)
        rc = jax.random.randint(jax.random.fold_in(k_rc, salt), (E, 1),
                                0, N_CLASS).astype(jnp.int32)              # (E, 1)
        return ef, rc

    # E=200: multiple of 4 (pure lane-dense path, 2 grid steps of 32 groups).
    # E=77 : ragged (partial last 4-edge group AND partial last grid block).
    for salt, E in enumerate((200, 77)):
        edge_feat, rxn_class = make_inputs(E, salt)
        out = jax.block_until_ready(
            sparse_bond_encoder(edge_feat, rxn_class, fused_bd))
        ref = _reference(edge_feat, rxn_class, bond_tables, rxn_table, w_full, bias)
        assert out.shape == (E, DIM)
        # table@W / bias folding reassociates fp32 sums -> not bit-identical.
        assert jnp.allclose(out, ref, atol=1e-4, rtol=1e-4), f"mismatch at E={E}"

    print("KERNEL_OK")
</pallas_src>

<mosaic_0001>
module attributes {stable_mosaic.version = 11 : i64} {
  func.func @_fused_encoder_kernel(%arg0: i32, %arg1: memref<32x16xi32, #tpu.memory_space<vmem>>, %arg2: memref<512x128xf32, #tpu.memory_space<vmem>>, %arg3: memref<32x128xf32, #tpu.memory_space<vmem>>) attributes {dimension_semantics = [#tpu.dimension_semantics<parallel>], iteration_bounds = array<i64: 2>, scalar_prefetch = 0 : i64, scratch_operands = 0 : i64, tpu.core_type = #tpu.core_type<tc>, window_params = [{transform_indices = @transform_0, window_bounds = array<i64: 32, 16>}, {pipeline_mode = #tpu.pipeline_mode<synchronous>, transform_indices = @transform_1, window_bounds = array<i64: 512, 128>}, {transform_indices = @transform_2, window_bounds = array<i64: 32, 128>}]} {
    %c0 = arith.constant 0 : index
    %c0_0 = arith.constant 0 : index
    %0 = vector.load %arg1[%c0, %c0_0] : memref<32x16xi32, #tpu.memory_space<vmem>>, vector<32x16xi32>
    %1 = tpu.iota {dimensions = array<i32: 1>} : vector<32x128xi32>
    %2 = vector.extract_strided_slice %0 {offsets = [0, 0], sizes = [32, 1], strides = [1, 1]} : vector<32x16xi32> to vector<32x1xi32>
    %3 = vector.broadcast %2 : vector<32x1xi32> to vector<32x128xi32>
    %4 = arith.cmpi eq, %3, %1 : vector<32x128xi32>
    %5 = vector.extract_strided_slice %0 {offsets = [0, 1], sizes = [32, 1], strides = [1, 1]} : vector<32x16xi32> to vector<32x1xi32>
    %6 = vector.broadcast %5 : vector<32x1xi32> to vector<32x128xi32>
    %7 = arith.cmpi eq, %6, %1 : vector<32x128xi32>
    %8 = arith.ori %4, %7 : vector<32x128xi1>
    %9 = vector.extract_strided_slice %0 {offsets = [0, 2], sizes = [32, 1], strides = [1, 1]} : vector<32x16xi32> to vector<32x1xi32>
    %10 = vector.broadcast %9 : vector<32x1xi32> to vector<32x128xi32>
    %11 = arith.cmpi eq, %10, %1 : vector<32x128xi32>
    %12 = arith.ori %8, %11 : vector<32x128xi1>
    %13 = vector.extract_strided_slice %0 {offsets = [0, 3], sizes = [32, 1], strides = [1, 1]} : vector<32x16xi32> to vector<32x1xi32>
    %14 = vector.broadcast %13 : vector<32x1xi32> to vector<32x128xi32>
    %15 = arith.cmpi eq, %14, %1 : vector<32x128xi32>
    %16 = arith.ori %12, %15 : vector<32x128xi1>
    %17 = arith.extui %16 : vector<32x128xi1> to vector<32x128xi32>
    %18 = arith.sitofp %17 : vector<32x128xi32> to vector<32x128xf32>
    %19 = vector.extract_strided_slice %0 {offsets = [0, 4], sizes = [32, 1], strides = [1, 1]} : vector<32x16xi32> to vector<32x1xi32>
    %20 = vector.broadcast %19 : vector<32x1xi32> to vector<32x128xi32>
    %21 = arith.cmpi eq, %20, %1 : vector<32x128xi32>
    %22 = vector.extract_strided_slice %0 {offsets = [0, 5], sizes = [32, 1], strides = [1, 1]} : vector<32x16xi32> to vector<32x1xi32>
    %23 = vector.broadcast %22 : vector<32x1xi32> to vector<32x128xi32>
    %24 = arith.cmpi eq, %23, %1 : vector<32x128xi32>
    %25 = arith.ori %21, %24 : vector<32x128xi1>
    %26 = vector.extract_strided_slice %0 {offsets = [0, 6], sizes = [32, 1], strides = [1, 1]} : vector<32x16xi32> to vector<32x1xi32>
    %27 = vector.broadcast %26 : vector<32x1xi32> to vector<32x128xi32>
    %28 = arith.cmpi eq, %27, %1 : vector<32x128xi32>
    %29 = arith.ori %25, %28 : vector<32x128xi1>
    %30 = vector.extract_strided_slice %0 {offsets = [0, 7], sizes = [32, 1], strides = [1, 1]} : vector<32x16xi32> to vector<32x1xi32>
    %31 = vector.broadcast %30 : vector<32x1xi32> to vector<32x128xi32>
    %32 = arith.cmpi eq, %31, %1 : vector<32x128xi32>
    %33 = arith.ori %29, %32 : vector<32x128xi1>
    %34 = arith.extui %33 : vector<32x128xi1> to vector<32x128xi32>
    %35 = arith.sitofp %34 : vector<32x128xi32> to vector<32x128xf32>
    %36 = vector.extract_strided_slice %0 {offsets = [0, 8], sizes = [32, 1], strides = [1, 1]} : vector<32x16xi32> to vector<32x1xi32>
    %37 = vector.broadcast %36 : vector<32x1xi32> to vector<32x128xi32>
    %38 = arith.cmpi eq, %37, %1 : vector<32x128xi32>
    %39 = vector.extract_strided_slice %0 {offsets = [0, 9], sizes = [32, 1], strides = [1, 1]} : vector<32x16xi32> to vector<32x1xi32>
    %40 = vector.broadcast %39 : vector<32x1xi32> to vector<32x128xi32>
    %41 = arith.cmpi eq, %40, %1 : vector<32x128xi32>
    %42 = arith.ori %38, %41 : vector<32x128xi1>
    %43 = vector.extract_strided_slice %0 {offsets = [0, 10], sizes = [32, 1], strides = [1, 1]} : vector<32x16xi32> to vector<32x1xi32>
    %44 = vector.broadcast %43 : vector<32x1xi32> to vector<32x128xi32>
    %45 = arith.cmpi eq, %44, %1 : vector<32x128xi32>
    %46 = arith.ori %42, %45 : vector<32x128xi1>
    %47 = vector.extract_strided_slice %0 {offsets = [0, 11], sizes = [32, 1], strides = [1, 1]} : vector<32x16xi32> to vector<32x1xi32>
    %48 = vector.broadcast %47 : vector<32x1xi32> to vector<32x128xi32>
    %49 = arith.cmpi eq, %48, %1 : vector<32x128xi32>
    %50 = arith.ori %46, %49 : vector<32x128xi1>
    %51 = arith.extui %50 : vector<32x128xi1> to vector<32x128xi32>
    %52 = arith.sitofp %51 : vector<32x128xi32> to vector<32x128xf32>
    %53 = vector.extract_strided_slice %0 {offsets = [0, 12], sizes = [32, 1], strides = [1, 1]} : vector<32x16xi32> to vector<32x1xi32>
    %54 = vector.broadcast %53 : vector<32x1xi32> to vector<32x128xi32>
    %55 = arith.cmpi eq, %54, %1 : vector<32x128xi32>
    %56 = vector.extract_strided_slice %0 {offsets = [0, 13], sizes = [32, 1], strides = [1, 1]} : vector<32x16xi32> to vector<32x1xi32>
    %57 = vector.broadcast %56 : vector<32x1xi32> to vector<32x128xi32>
    %58 = arith.cmpi eq, %57, %1 : vector<32x128xi32>
    %59 = arith.ori %55, %58 : vector<32x128xi1>
    %60 = vector.extract_strided_slice %0 {offsets = [0, 14], sizes = [32, 1], strides = [1, 1]} : vector<32x16xi32> to vector<32x1xi32>
    %61 = vector.broadcast %60 : vector<32x1xi32> to vector<32x128xi32>
    %62 = arith.cmpi eq, %61, %1 : vector<32x128xi32>
    %63 = arith.ori %59, %62 : vector<32x128xi1>
    %64 = vector.extract_strided_slice %0 {offsets = [0, 15], sizes = [32, 1], strides = [1, 1]} : vector<32x16xi32> to vector<32x1xi32>
    %65 = vector.broadcast %64 : vector<32x1xi32> to vector<32x128xi32>
    %66 = arith.cmpi eq, %65, %1 : vector<32x128xi32>
    %67 = arith.ori %63, %66 : vector<32x128xi1>
    %68 = arith.extui %67 : vector<32x128xi1> to vector<32x128xi32>
    %69 = arith.sitofp %68 : vector<32x128xi32> to vector<32x128xf32>
    %70 = tpu.concatenate %18, %35, %52, %69 in 1 : vector<32x128xf32>, vector<32x128xf32>, vector<32x128xf32>, vector<32x128xf32> -> vector<32x512xf32>
    %c0_1 = arith.constant 0 : index
    %c0_2 = arith.constant 0 : index
    %71 = vector.load %arg2[%c0_1, %c0_2] : memref<512x128xf32, #tpu.memory_space<vmem>>, vector<512x128xf32>
    %cst = arith.constant dense<0.000000e+00> : vector<32x128xf32>
    %72 = tpu.matmul %70, %71, %cst {dimension_numbers = #tpu.dot_dimension_numbers<[1], [0], [0], [1], [0, 0, 1, 1], [], []>} : vector<32x512xf32>, vector<512x128xf32>, vector<32x128xf32> -> vector<32x128xf32>
    %c0_3 = arith.constant 0 : index
    %c0_4 = arith.constant 0 : index
    %73 = vector.load %arg3[%c0_3, %c0_4] : memref<32x128xf32, #tpu.memory_space<vmem>>, vector<32x128xf32>
    tpu.vector_store %arg3[%c0_3, %c0_4], %72 {strides = array<i32>} : memref<32x128xf32, #tpu.memory_space<vmem>>, vector<32x128xf32>,
    return
  }
  func.func @transform_0(%arg0: i32) -> (i32, i32) {
    %c0_i32 = arith.constant 0 : i32
    %c0_i32_0 = arith.constant 0 : i32
    return %arg0, %c0_i32 : i32, i32
  }
  func.func @transform_1(%arg0: i32) -> (i32, i32) {
    %c0_i32 = arith.constant 0 : i32
    %c0_i32_0 = arith.constant 0 : i32
    %c0_i32_1 = arith.constant 0 : i32
    return %c0_i32, %c0_i32_0 : i32, i32
  }
  func.func @transform_2(%arg0: i32) -> (i32, i32) {
    %c0_i32 = arith.constant 0 : i32
    %c0_i32_0 = arith.constant 0 : i32
    return %arg0, %c0_i32 : i32, i32
  }
}

</mosaic_0001>

<bundles_post_ra>
// kernel: sparse_bond_encoder.1
= control target key start
LH: loop header
LB: loop body
LE: loop exit
PB: predicated region body
PF: predicated region fallthrough
CT: control target
= control target key end

     0   :  { %s1469_s9 = smov 0   ;;  %s1471_s10 = smov 0   ;;  %s2051_s0 = inlined_call_operand.vmem [shape: s32[50,16], index: 0, kind: input, shape index: {}]   ;;  %s2052_s1 = inlined_call_operand.vmem [shape: f32[512,128], index: 1, kind: input, shape index: {}]   ;;  %s2053_s2 = inlined_call_operand.vmem [shape: f32[50,128], index: 2, kind: output, shape index: {}]  }
   0x1   :  { %s1473_s11 = smov 0  }
   0x2 LB: > { %s1482_s12 = sadd.s32 4294967295, %s1403_s11   ;;  %s1484_s13 = sadd.s32 1, %s1403_s11   ;;  %s1403_s11 = sphi %s1473_s11, %s2064_s11   ;;  %s1399_s10 = sphi %s1471_s10, %s2063_s10   ;;  %s1395_s9 = sphi %s1469_s9, %s2062_s9  }
   0x3   : > { %s63_s14 = ssub.s32 %s1403_s11, %s1484_s13  ;;  %s66_s15 = sadd.s32 1, %s1399_s10 }
   0x4   : > { %p64_p0 = scmp.eq.s32.totalorder %s63_s14, 0  ;;  %p76_p1 = scmp.ne.s32.totalorder %s1399_s10, %s1395_s9 }
   0x5   : > { %p77_p2 = scmp.eq.s32.totalorder %s1482_s12, 1  ;;  %p975_p3 = scmp.ge.s32.totalorder %s1403_s11, 1 }
   0x6   : > { %s1492_s16 = scalar_select %p64_p0, %s1399_s10, %s66_s15  }
   0x7   : > { %p1494_p4 = por %p77_p2, %p76_p1  ;;  %p121_p5 = scmp.lt.s32.totalorder %s1403_s11, 3 }
   0x9   : > { %p122_p6 = pnand %p975_p3, %p121_p5 }
   0xa   : > { %s1499_s18 = sshll.u32 (!%p122_p6), %s1482_s12, 2  ;;  %v1437_v0 = vmov (!%p122_p6), 12   ;;  %v1438_v1 = vmov (!%p122_p6), 7   ;;  %v1439_v3 = vmov (!%p122_p6), 3   ;;  %v1440_v4 = vmov (!%p122_p6), 13   ;;  %v523_v17 = vld [vmem:[%s2052_s1 + $0x80] sm:$0xff] (!%p122_p6) }
   0xb   : > { %125 = sbr.rel (%p122_p6) target bundleno = 625 (0x271), region = 28  ;;  %1288 = vset.pattern.permute.xlu1 (!%p122_p6), %v1437_v0  ;;  %1295 = vset.pattern.permute.xlu0 (!%p122_p6), %v1438_v1  ;;  %p151_p7 = scmp.lt.s32.totalorder (!%p122_p6), %s1499_s18, 6  ;;  %v1441_v5 = vmov (!%p122_p6), 5   ;;  %v1442_v6 = vmov (!%p122_p6), 0   ;;  %v1443_v8 = vmov (!%p122_p6), 6   ;;  %v1444_v9 = vmov (!%p122_p6), 8  }
   0xc   : > { %v1445_v10 = vmov (!%p122_p6), 14   ;;  %v1446_v11 = vmov (!%p122_p6), 2   ;;  %v1447_v12 = vmov (!%p122_p6), 15   ;;  %v1448_v13 = vmov (!%p122_p6), 10   ;;  %v524_v18 = vld [vmem:[%s2052_s1 + $0x88] sm:$0xff] (!%p122_p6)  ;;  %v507_v20 = vld [vmem:[%s2052_s1] sm:$0xff] (!%p122_p6) }
   0xd   : > { %v1449_v14 = vmov (!%p122_p6), 4   ;;  %v1450_v16 = vmov (!%p122_p6), 11   ;;  %v1119_v19 = vpack.c.bf16 (!%p122_p6), %v524_v18, %v523_v17  ;;  %v508_v21 = vld [vmem:[%s2052_s1 + $0x8] sm:$0xff] (!%p122_p6)  ;;  %v525_v23 = vld [vmem:[%s2052_s1 + $0x90] sm:$0xff] (!%p122_p6)  ;;  %v526_v24 = vld [vmem:[%s2052_s1 + $0x98] sm:$0xff] (!%p122_p6)  ;;  %v1451_v53 = vmov (!%p122_p6), 1  }
   0xe   : > { %v1121_v22 = vpack.c.bf16 (!%p122_p6), %v508_v21, %v507_v20  ;;  %v1123_v25 = vpack.c.bf16 (!%p122_p6), %v526_v24, %v525_v23  ;;  %v509_v26 = vld [vmem:[%s2052_s1 + $0x10] sm:$0xff] (!%p122_p6)  ;;  %v510_v27 = vld [vmem:[%s2052_s1 + $0x18] sm:$0xff] (!%p122_p6)  ;;  %v527_v29 = vld [vmem:[%s2052_s1 + $0xa0] sm:$0xff] (!%p122_p6)  ;;  %s143_s29 = sand.u32 (!%p122_p6), 1, %s1395_s9  }
   0xf   : > { %1120 = vmatprep.subr.bf16.mxu0 (!%p122_p6), %v1119_v19  ;;  %v1125_v28 = vpack.c.bf16 (!%p122_p6), %v510_v27, %v509_v26  ;;  %v528_v30 = vld [vmem:[%s2052_s1 + $0xa8] sm:$0xff] (!%p122_p6)  ;;  %v511_v32 = vld [vmem:[%s2052_s1 + $0x20] sm:$0xff] (!%p122_p6)  ;;  %v529_v41 = vld [vmem:[%s2052_s1 + $0xb0] sm:$0xff] (!%p122_p6)  ;;  %s976_s30 = sshll.u32 (!%p122_p6), %s143_s29, 5 }
  0x10   : > { %1122 = vmatpush3.bf16.msra.mxu0 (!%p122_p6), %v1121_v22  ;;  %v1127_v31 = vpack.c.bf16 (!%p122_p6), %v528_v30, %v527_v29  ;;  %v512_v33 = vld [vmem:[%s2052_s1 + $0x28] sm:$0xff] (!%p122_p6)  ;;  %v555_v34 = vld [vmem:[%s2052_s1 + $0x180] sm:$0xff] (!%p122_p6)  ;;  %v530_v42 = vld [vmem:[%s2052_s1 + $0xb8] sm:$0xff] (!%p122_p6)  ;;  %s1989_s3 = scalar_lea.vmem (!%p122_p6), [#allocation2], %s976_s30  }
  0x11   : > { %1124 = vmatprep.subr.bf16.mxu0 (!%p122_p6), %v1123_v25  ;;  %v1129_v35 = vpack.c.bf16 (!%p122_p6), %v512_v33, %v511_v32  ;;  %v556_v36 = vld [vmem:[%s2052_s1 + $0x188] sm:$0xff] (!%p122_p6)  ;;  %v539_v37 = vld [vmem:[%s2052_s1 + $0x100] sm:$0xff] (!%p122_p6)  ;;  %v1131_v43 = vpack.c.bf16 (!%p122_p6), %v530_v42, %v529_v41  ;;  %v513_v44 = vld [vmem:[%s2052_s1 + $0x30] sm:$0xff] (!%p122_p6) }
  0x12   : > { %s152_s19 = scalar_select %p151_p7, %s1499_s18, 6  ;;  %v540_v38 = vld [vmem:[%s2052_s1 + $0x108] sm:$0xff]  ;;  %v1151_v39 = vpack.c.bf16 %v556_v36, %v555_v34  ;;  %v514_v45 = vld [vmem:[%s2052_s1 + $0x38] sm:$0xff]  ;;  %v557_v46 = vld [vmem:[%s2052_s1 + $0x190] sm:$0xff] }
  0x13   : > { %v1153_v40 = vpack.c.bf16 %v540_v38, %v539_v37  ;;  %v1133_v47 = vpack.c.bf16 %v514_v45, %v513_v44  ;;  %v558_v48 = vld [vmem:[%s2052_s1 + $0x198] sm:$0xff]  ;;  %v541_v49 = vld [vmem:[%s2052_s1 + $0x110] sm:$0xff]  ;;  %v531_v54 = vld [vmem:[%s2052_s1 + $0xc0] sm:$0xff]  ;;  %v1452_v38 = vmov 9   ;;  %s753_s9 = ssub.s32 (%p1494_p4), 7, %s1499_s18  ;;  %s1028_s4 = sshll.u32 (%p1494_p4), %s1482_s12, 5 }
  0x14   : > { %s978_s20 = sshll.u32 %s152_s19, 3  ;;  %1126 = vmatpush3.bf16.msra.mxu0 %v1125_v28  ;;  %1152 = vmatprep.subr.bf16.mxu1 %v1151_v39  ;;  %v542_v50 = vld [vmem:[%s2052_s1 + $0x118] sm:$0xff]  ;;  %v1155_v51 = vpack.c.bf16 %v558_v48, %v557_v46  ;;  %v532_v55 = vld [vmem:[%s2052_s1 + $0xc8] sm:$0xff]  ;;  %v515_v57 = vld [vmem:[%s2052_s1 + $0x40] sm:$0xff]  ;;  %p754_p8 = scmp.lt.s32.totalorder (%p1494_p4), %s753_s9, 4 }
  0x15   : > { %s1508_s23 = scalar_lea.vmem %s2051_s0, %s978_s20  ;;  %1128 = vmatprep.subr.bf16.mxu0 %v1127_v31  ;;  %1154 = vmatpush3.bf16.msra.mxu1 %v1153_v40  ;;  %v1157_v52 = vpack.c.bf16 %v542_v50, %v541_v49  ;;  %v1135_v56 = vpack.c.bf16 %v532_v55, %v531_v54  ;;  %v516_v58 = vld [vmem:[%s2052_s1 + $0x48] sm:$0xff]  ;;  %v559_v59 = vld [vmem:[%s2052_s1 + $0x1a0] sm:$0xff]  ;;  %v533_v20 = vld [vmem:[%s2052_s1 + $0xd0] sm:$0xff] }
  0x16   : > { %v1511_v2 = vld [vmem:[%s1508_s23] sm:$0xff]  ;;  %v1524_v7 = vld [vmem:[%s1508_s23 + $0x8] sm:$0xff]  ;;  %v1550_v15 = vld [vmem:[%s1508_s23 + $0x10] sm:$0xff]  ;;  %1156 = vmatprep.subr.bf16.mxu1 %v1155_v51  ;;  %v1137_v60 = vpack.c.bf16 %v516_v58, %v515_v57 }
  0x17   : > { %312 = vperm.xlu0 %1295, %v1511_v2   ;;  %424 = vperm.xlu1 %1288, %v1511_v2   ;;  %v560_v61 = vld [vmem:[%s2052_s1 + $0x1a8] sm:$0xff]  ;;  %v543_v62 = vld [vmem:[%s2052_s1 + $0x120] sm:$0xff]  ;;  %v1670_v19 = vld [vmem:[%s1508_s23 + $0x18] sm:$0xff]  ;;  %s2002_s23 = scalar_lea.vmem (%p1494_p4), %s2053_s2, %s1028_s4  }
  0x18   : > { %1130 = vmatpush3.bf16.msra.mxu0 %v1129_v35  ;;  %v544_v63 = vld [vmem:[%s2052_s1 + $0x128] sm:$0xff]  ;;  %v1159_v17 = vpack.c.bf16 %v560_v61, %v559_v59  ;;  %v534_v21 = vld [vmem:[%s2052_s1 + $0xd8] sm:$0xff]  ;;  %v517_v23 = vld [vmem:[%s2052_s1 + $0x50] sm:$0xff] }
  0x19   : > { %1132 = vmatprep.subr.bf16.mxu0 %v1131_v43  ;;  %1158 = vmatpush3.bf16.msra.mxu1 %v1157_v52  ;;  %v1161_v18 = vpack.c.bf16 %v544_v63, %v543_v62  ;;  %v1139_v22 = vpack.c.bf16 %v534_v21, %v533_v20  ;;  %v518_v24 = vld [vmem:[%s2052_s1 + $0x58] sm:$0xff]  ;;  %v561_v25 = vld [vmem:[%s2052_s1 + $0x1b0] sm:$0xff]  ;;  %v535_v32 = vld [vmem:[%s2052_s1 + $0xe0] sm:$0xff] }
  0x1a   : > { %1160 = vmatprep.subr.bf16.mxu1 %v1159_v17  ;;  %v1141_v26 = vpack.c.bf16 %v518_v24, %v517_v23  ;;  %v562_v27 = vld [vmem:[%s2052_s1 + $0x1b8] sm:$0xff]  ;;  %v545_v28 = vld [vmem:[%s2052_s1 + $0x130] sm:$0xff]  ;;  %v536_v33 = vld [vmem:[%s2052_s1 + $0xe8] sm:$0xff] }
  0x1b   : > { %1298 = vset.pattern.permute.xlu0 %v1439_v3  ;;  %1289 = vset.pattern.permute.xlu1 %v1440_v4  ;;  %v546_v29 = vld [vmem:[%s2052_s1 + $0x138] sm:$0xff]  ;;  %v1163_v30 = vpack.c.bf16 %v562_v27, %v561_v25  ;;  %v1143_v34 = vpack.c.bf16 %v536_v33, %v535_v32  ;;  %v519_v35 = vld [vmem:[%s2052_s1 + $0x60] sm:$0xff]  ;;  %v520_v36 = vld [vmem:[%s2052_s1 + $0x68] sm:$0xff]  ;;  %v169_v32 = vlaneseq }
  0x1c   : > { %228 = vperm.xlu0 %1298, %v1511_v2   ;;  %440 = vperm.xlu1 %1289, %v1511_v2   ;;  %v1165_v31 = vpack.c.bf16 %v546_v29, %v545_v28  ;;  %v563_v37 = vld [vmem:[%s2052_s1 + $0x1c0] sm:$0xff]  ;;  %v1145_v39 = vpack.c.bf16 %v520_v36, %v519_v35  ;;  %v564_v40 = vld [vmem:[%s2052_s1 + $0x1c8] sm:$0xff]  ;;  %v537_v45 = vld [vmem:[%s2052_s1 + $0xf0] sm:$0xff] }
  0x1d   : > { %1134 = vmatpush3.bf16.msra.mxu0 %v1133_v47  ;;  %1162 = vmatpush3.bf16.msra.mxu1 %v1161_v18  ;;  %v547_v41 = vld [vmem:[%s2052_s1 + $0x140] sm:$0xff]  ;;  %v548_v42 = vld [vmem:[%s2052_s1 + $0x148] sm:$0xff]  ;;  %v1167_v43 = vpack.c.bf16 %v564_v40, %v563_v37  ;;  %v538_v46 = vld [vmem:[%s2052_s1 + $0xf8] sm:$0xff] }
  0x1e   : > { %1136 = vmatprep.subr.bf16.mxu0 %v1135_v56  ;;  %1164 = vmatprep.subr.bf16.mxu1 %v1163_v30  ;;  %v1169_v44 = vpack.c.bf16 %v548_v42, %v547_v41  ;;  %v1147_v47 = vpack.c.bf16 %v538_v46, %v537_v45  ;;  %v521_v48 = vld [vmem:[%s2052_s1 + $0x70] sm:$0xff]  ;;  %v522_v49 = vld [vmem:[%s2052_s1 + $0x78] sm:$0xff]  ;;  %v567_v58 = vld [vmem:[%s2052_s1 + $0x1e0] sm:$0xff] }
  0x1f   : > { %v565_v50 = vld [vmem:[%s2052_s1 + $0x1d0] sm:$0xff]  ;;  %v1149_v51 = vpack.c.bf16 %v522_v49, %v521_v48  ;;  %v566_v52 = vld [vmem:[%s2052_s1 + $0x1d8] sm:$0xff]  ;;  %v568_v59 = vld [vmem:[%s2052_s1 + $0x1e8] sm:$0xff] }
  0x20   : > { %1299 = vset.pattern.permute.xlu0 %v1441_v5  ;;  %1290 = vset.pattern.permute.xlu1 %v1442_v6  ;;  %v549_v54 = vld [vmem:[%s2052_s1 + $0x150] sm:$0xff]  ;;  %v550_v55 = vld [vmem:[%s2052_s1 + $0x158] sm:$0xff]  ;;  %v1171_v56 = vpack.c.bf16 %v566_v52, %v565_v50  ;;  %v551_v61 = vld [vmem:[%s2052_s1 + $0x160] sm:$0xff] }
  0x21   : > { %272 = vperm.xlu0 %1299, %v1511_v2   ;;  %172 = vperm.xlu1 %1290, %v1511_v2   ;;  %v1173_v57 = vpack.c.bf16 %v550_v55, %v549_v54  ;;  %v552_v62 = vld [vmem:[%s2052_s1 + $0x168] sm:$0xff]  ;;  %v569_v17 = vld [vmem:[%s2052_s1 + $0x1f0] sm:$0xff]  ;;  %v570_v18 = vld [vmem:[%s2052_s1 + $0x1f8] sm:$0xff] }
  0x22   : > { %1138 = vmatpush3.bf16.msra.mxu0 %v1137_v60  ;;  %1166 = vmatpush3.bf16.msra.mxu1 %v1165_v31  ;;  %v1175_v60 = vpack.c.bf16 %v568_v59, %v567_v58  ;;  %v1177_v63 = vpack.c.bf16 %v552_v62, %v551_v61  ;;  %v1179_v20 = vpack.c.bf16 %v570_v18, %v569_v17  ;;  %v553_v21 = vld [vmem:[%s2052_s1 + $0x170] sm:$0xff] }
  0x23   : > { %1140 = vmatprep.subr.bf16.mxu0 %v1139_v22  ;;  %1168 = vmatprep.subr.bf16.mxu1 %v1167_v43  ;;  %v554_v22 = vld [vmem:[%s2052_s1 + $0x178] sm:$0xff] }
  0x24   : > { %v1181_v23 = vpack.c.bf16 %v554_v22, %v553_v21 }
  0x25   : > { %275 = vperm.xlu0 %1299, %v1524_v7   ;;  %1291 = vset.pattern.permute.xlu1 %v1443_v8 }
  0x26   : > { %292 = vperm.xlu1 %1291, %v1511_v2   ;;  %1142 = vmatpush3.bf16.msra.mxu0 %v1141_v26 }
  0x27   : > { %1144 = vmatprep.subr.bf16.mxu0 %v1143_v34  ;;  %1170 = vmatpush3.bf16.msra.mxu1 %v1169_v44  ;;  %v1835_v34 = vand.u32 127, %v169_v32 }
  0x28   : > { %1172 = vmatprep.subr.bf16.mxu1 %v1171_v56 }
  0x29   : > { %1304 = vset.pattern.permute.xlu0 %v1442_v6 }
  0x2a   : > { %175 = vperm.xlu0 %1304, %v1524_v7   ;;  %1292 = vset.pattern.permute.xlu1 %v1444_v9 }
  0x2b   : > { %340 = vperm.xlu1 %1292, %v1511_v2   ;;  %1146 = vmatpush3.bf16.msra.mxu0 %v1145_v39 }
  0x2c   : > { %1148 = vmatprep.subr.bf16.mxu0 %v1147_v47  ;;  %1174 = vmatpush3.bf16.msra.mxu1 %v1173_v57 }
  0x2d   : > { %1176 = vmatprep.subr.bf16.mxu1 %v1175_v60 }
  0x2e   : > { %1307 = vset.pattern.permute.xlu0 %v1444_v9 }
  0x2f   : > { %343 = vperm.xlu0 %1307, %v1524_v7   ;;  %1293 = vset.pattern.permute.xlu1 %v1445_v10 }
  0x30   : > { %460 = vperm.xlu1 %1293, %v1511_v2   ;;  %1150 = vmatpush3.bf16.msra.mxu0 %v1149_v51 }
  0x31   : > { %1178 = vmatpush3.bf16.msra.mxu1 %v1177_v63 }
  0x32   : > { %1180 = vmatprep.subr.bf16.mxu1 %v1179_v20 }
  0x33   : > { %1310 = vset.pattern.permute.xlu0 %v1446_v11 }
  0x34   : > { %211 = vperm.xlu0 %1310, %v1524_v7   ;;  %1294 = vset.pattern.permute.xlu1 %v1446_v11 }
  0x35   : > { %208 = vperm.xlu1 %1294, %v1511_v2   ;;  %1182 = vmatpush3.bf16.msra.mxu1 %v1181_v23 }
  0x38   : > { %1313 = vset.pattern.permute.xlu0 %v1447_v12 }
  0x39   : > { %483 = vperm.xlu0 %1313, %v1524_v7   ;;  %1296 = vset.pattern.permute.xlu1 %v1448_v13 }
  0x3a   : > { %376 = vperm.xlu1 %1296, %v1511_v2  }
  0x3d   : > { %1314 = vset.pattern.permute.xlu0 %v1449_v14 }
  0x3e   : > { %256 = vperm.xlu0 %1314, %v1511_v2   ;;  %1297 = vset.pattern.permute.xlu1 %v1447_v12 }
  0x3f   : > { %480 = vperm.xlu1 %1297, %v1511_v2  }
  0x42   : > { %262 = vperm.xlu0 %1314, %v1550_v15  }
  0x43   : > { %1300 = vset.pattern.permute.xlu1 %v1450_v16 }
  0x44   : > { %396 = vperm.xlu1 %1300, %v1511_v2  }
  0x46   : > { %1319 = vset.pattern.permute.xlu0 %v1440_v4 }
  0x47   : > { %446 = vperm.xlu0 %1319, %v1550_v15  }
  0x48   : > { %1301 = vset.pattern.permute.xlu1 %v1449_v14 }
  0x49   : > { %259 = vperm.xlu1 %1301, %v1524_v7  }
  0x4b   : > { %1322 = vset.pattern.permute.xlu0 %v1443_v8 }
  0x4c   : > { %298 = vperm.xlu0 %1322, %v1550_v15  }
  0x4d   : > { %1302 = vset.pattern.permute.xlu1 %v1437_v0 }
  0x4e   : > { %427 = vperm.xlu1 %1302, %v1524_v7  }
  0x50   : > { %1325 = vset.pattern.permute.xlu0 %v1445_v10 }
  0x51   : > { %466 = vperm.xlu0 %1325, %v1550_v15  }
  0x52   : > { %1303 = vset.pattern.permute.xlu1 %v1440_v4 }
  0x53   : > { %443 = vperm.xlu1 %1303, %v1524_v7  }
  0x55   : > { %1328 = vset.pattern.permute.xlu0 %v1448_v13 }
  0x56   : > { %382 = vperm.xlu0 %1328, %v1550_v15  }
  0x57   : > { %1305 = vset.pattern.permute.xlu1 %v1451_v53 }
  0x58   : > { %191 = vperm.xlu1 %1305, %v1524_v7  }
  0x5a   : > { %1331 = vset.pattern.permute.xlu0 %v1450_v16 }
  0x5b   : > { %402 = vperm.xlu0 %1331, %v1550_v15  }
  0x5c   : > { %1306 = vset.pattern.permute.xlu1 %v1443_v8 }
  0x5d   : > { %295 = vperm.xlu1 %1306, %v1524_v7  }
  0x5f   : > { %1334 = vset.pattern.permute.xlu0 %v1437_v0 }
  0x60   : > { %433 = vperm.xlu0 %1334, %v1670_v19  }
  0x61   : > { %1308 = vset.pattern.permute.xlu1 %v1452_v38 }
  0x62   : > { %359 = vperm.xlu1 %1308, %v1524_v7  }
  0x64   : > { %1335 = vset.pattern.permute.xlu0 %v1451_v53 }
  0x65   : > { %188 = vperm.xlu0 %1335, %v1511_v2  }
  0x66   : > { %1309 = vset.pattern.permute.xlu1 %v1445_v10 }
  0x67   : > { %463 = vperm.xlu1 %1309, %v1524_v7  }
  0x69   : > { %197 = vperm.xlu0 %1335, %v1670_v19  }
  0x6b   : > { %1311 = vset.pattern.permute.xlu1 %v1438_v1 }
  0x6c   : > { %315 = vperm.xlu1 %1311, %v1524_v7  }
  0x6d   : > { %1338 = vset.pattern.permute.xlu0 %v1452_v38 }
  0x6e   : > { %356 = vperm.xlu0 %1338, %v1511_v2  }
  0x70   : > { %1312 = vset.pattern.permute.xlu1 %v1448_v13 }
  0x71   : > { %379 = vperm.xlu1 %1312, %v1524_v7  }
  0x72   : > { %365 = vperm.xlu0 %1338, %v1670_v19  }
  0x75   : > { %1315 = vset.pattern.permute.xlu1 %v1439_v3 }
  0x76   : > { %231 = vperm.xlu1 %1315, %v1524_v7   ;;  %1343 = vset.pattern.permute.xlu0 %v1438_v1 }
  0x77   : > { %321 = vperm.xlu0 %1343, %v1670_v19  }
  0x7a   : > { %1316 = vset.pattern.permute.xlu1 %v1450_v16 }
  0x7b   : > { %399 = vperm.xlu1 %1316, %v1524_v7   ;;  %1346 = vset.pattern.permute.xlu0 %v1439_v3 }
  0x7c   : > { %237 = vperm.xlu0 %1346, %v1670_v19  }
  0x7f   : > { %1317 = vset.pattern.permute.xlu1 %v1441_v5 }
  0x80   : > { %278 = vperm.xlu1 %1317, %v1550_v15   ;;  %1348 = vset.pattern.permute.xlu0 %v1447_v12 }
  0x84   : > { %1318 = vset.pattern.permute.xlu1 %v1437_v0 }
  0x85   : > { %430 = vperm.xlu1 %1318, %v1550_v15  }
  0x89   : > { %1320 = vset.pattern.permute.xlu1 %v1442_v6 }
  0x8a   : > { %178 = vperm.xlu1 %1320, %v1550_v15  }
  0x8e   : > { %1321 = vset.pattern.permute.xlu1 %v1451_v53 }
  0x8f   : > { %194 = vperm.xlu1 %1321, %v1550_v15  }
  0x93   : > { %1323 = vset.pattern.permute.xlu1 %v1444_v9 }
  0x94   : > { %346 = vperm.xlu1 %1323, %v1550_v15  }
  0x96   : > { %v425_v2 = vpop.permute.xlu1 %424  ;;  %v313_v7 = vpop.permute.xlu0 %312 }
  0x97   : > { %vm435_vm2 = vcmp.eq.s32.totalorder %v425_v2, %v1835_v34  ;;  %vm323_vm7 = vcmp.eq.s32.totalorder %v313_v7, %v1835_v34 }
  0x98   : > { %1324 = vset.pattern.permute.xlu1 %v1452_v38 }
  0x99   : > { %362 = vperm.xlu1 %1324, %v1550_v15  }
  0x9b   : > { %v441_v0 = vpop.permute.xlu1 %440  ;;  %v1807_v24 = vpop.permute.xlu0 %228 }
  0x9c   : > { %vm451_vm0 = vcmp.eq.s32.totalorder %v441_v0, %v1835_v34 }
  0x9d   : > { %1326 = vset.pattern.permute.xlu1 %v1446_v11  ;;  %vm455_vm4 = vmor %vm435_vm2, %vm451_vm0 }
  0x9e   : > { %214 = vperm.xlu1 %1326, %v1550_v15  }
  0xa0   : > { %v1811_v53 = vpop.permute.xlu1 %172  ;;  %v273_v25 = vpop.permute.xlu0 %272 }
  0xa1   : > { %vm283_vm3 = vcmp.eq.s32.totalorder %v273_v25, %v1835_v34  ;;  %vm183_vm14 = vcmp.eq.s32.totalorder %v1811_v53, %v1835_v34 }
  0xa2   : > { %1327 = vset.pattern.permute.xlu1 %v1438_v1 }
  0xa3   : > { %318 = vperm.xlu1 %1327, %v1550_v15  }
  0xa4   : > { %v1815_v26 = vpop.permute.xlu0 %275 }
  0xa5   : > { %v293_v27 = vpop.permute.xlu1 %292  ;;  %vm284_vm0 = vcmp.eq.s32.totalorder %v1815_v26, %v1835_v34 }
  0xa6   : > { %vm303_vm10 = vcmp.eq.s32.totalorder %v293_v27, %v1835_v34 }
  0xa7   : > { %1329 = vset.pattern.permute.xlu1 %v1447_v12 }
  0xa8   : > { %486 = vperm.xlu1 %1329, %v1550_v15  }
  0xa9   : > { %v1819_v28 = vpop.permute.xlu0 %175 }
  0xaa   : > { %v1821_v29 = vpop.permute.xlu1 %340 }
  0xac   : > { %1330 = vset.pattern.permute.xlu1 %v1439_v3 }
  0xad   : > { %234 = vperm.xlu1 %1330, %v1550_v15  }
  0xae   : > { %v1825_v30 = vpop.permute.xlu0 %343 }
  0xaf   : > { %v461_v1 = vpop.permute.xlu1 %460 }
  0xb0   : > { %vm471_vm1 = vcmp.eq.s32.totalorder %v461_v1, %v1835_v34 }
  0xb1   : > { %1332 = vset.pattern.permute.xlu1 %v1449_v14  ;;  %vm475_vm6 = vmor %vm455_vm4, %vm471_vm1  ;;  %vm239_vm4 = vcmp.eq.s32.totalorder %v1807_v24, %v1835_v34 }
  0xb2   : > { %265 = vperm.xlu1 %1332, %v1670_v19  }
  0xb3   : > { %v1829_v31 = vpop.permute.xlu0 %211 }
  0xb4   : > { %v1831_v33 = vpop.permute.xlu1 %208 }
  0xb5   : > { %vm219_vm1 = vcmp.eq.s32.totalorder %v1831_v33, %v1835_v34 }
  0xb6   : > { %1333 = vset.pattern.permute.xlu1 %v1441_v5 }
  0xb7   : > { %281 = vperm.xlu1 %1333, %v1670_v19  }
  0xb8   : > { %v1837_v3 = vpop.permute.xlu0 %483 }
  0xb9   : > { %v1839_v15 = vpop.permute.xlu1 %376 }
  0xbb   : > { %1336 = vset.pattern.permute.xlu1 %v1440_v4  ;;  %v1453_v4 = vmov 1.0  }
  0xbc   : > { %449 = vperm.xlu1 %1336, %v1670_v19  }
  0xbd   : > { %v257_v5 = vpop.permute.xlu0 %256 }
  0xbe   : > { %vm267_vm5 = vcmp.eq.s32.totalorder %v257_v5, %v1835_v34  ;;  %v481_v14 = vpop.permute.xlu1 %480 }
  0xbf   : > { %vm287_vm8 = vmor %vm267_vm5, %vm283_vm3  ;;  %vm491_vm9 = vcmp.eq.s32.totalorder %v481_v14, %v1835_v34 }
  0xc0   : > { %1337 = vset.pattern.permute.xlu1 %v1442_v6  ;;  %vm495_vm11 = vmor %vm475_vm6, %vm491_vm9 }
  0xc1   : > { %181 = vperm.xlu1 %1337, %v1670_v19   ;;  %1003 = vmatprep.mubr.msk.f32.mxu1 %vm495_vm11, %v1453_v4  ;;  %vm307_vm12 = vmor %vm287_vm8, %vm303_vm10  ;;  %v1854_v35 = vpop.permute.xlu0 %262 }
  0xc2   : > { %vm327_vm13 = vmor %vm307_vm12, %vm323_vm7 }
  0xc3   : > { %995 = vmatprep.mubr.msk.f32.mxu0 %vm327_vm13, %v1453_v4  ;;  %v1857_v36 = vpop.permute.xlu1 %396 }
  0xc5   : > { %1339 = vset.pattern.permute.xlu1 %v1443_v8 }
  0xc6   : > { %301 = vperm.xlu1 %1339, %v1670_v19   ;;  %v1861_v37 = vpop.permute.xlu0 %446 }
  0xc8   : > { %v260_v6 = vpop.permute.xlu1 %259 }
  0xc9   : > { %vm268_vm2 = vcmp.eq.s32.totalorder %v260_v6, %v1835_v34 }
  0xca   : > { %1340 = vset.pattern.permute.xlu1 %v1444_v9  ;;  %vm288_vm7 = vmor %vm268_vm2, %vm284_vm0 }
  0xcb   : > { %349 = vperm.xlu1 %1340, %v1670_v19   ;;  %v1865_v38 = vpop.permute.xlu0 %298 }
  0xcd   : > { %v428_v39 = vpop.permute.xlu1 %427 }
  0xce   : > { %vm436_vm9 = vcmp.eq.s32.totalorder %v428_v39, %v1835_v34 }
  0xcf   : > { %1341 = vset.pattern.permute.xlu1 %v1445_v10 }
  0xd0   : > { %469 = vperm.xlu1 %1341, %v1670_v19   ;;  %v1869_v40 = vpop.permute.xlu0 %466 }
  0xd2   : > { %v444_v41 = vpop.permute.xlu1 %443 }
  0xd3   : > { %vm452_vm6 = vcmp.eq.s32.totalorder %v444_v41, %v1835_v34 }
  0xd4   : > { %1342 = vset.pattern.permute.xlu1 %v1446_v11  ;;  %vm456_vm11 = vmor %vm436_vm9, %vm452_vm6  ;;  %vm184_vm6 = vcmp.eq.s32.totalorder %v1819_v28, %v1835_v34 }
  0xd5   : > { %217 = vperm.xlu1 %1342, %v1670_v19   ;;  %v1873_v8 = vpop.permute.xlu0 %382 }
  0xd7   : > { %v192_v42 = vpop.permute.xlu1 %191 }
  0xd9   : > { %1344 = vset.pattern.permute.xlu1 %v1448_v13 }
  0xda   : > { %385 = vperm.xlu1 %1344, %v1670_v19   ;;  %v1877_v9 = vpop.permute.xlu0 %402 }
  0xdc   : > { %v296_v43 = vpop.permute.xlu1 %295 }
  0xdd   : > { %vm304_vm8 = vcmp.eq.s32.totalorder %v296_v43, %v1835_v34 }
  0xde   : > { %1345 = vset.pattern.permute.xlu1 %v1447_v12  ;;  %vm308_vm13 = vmor %vm288_vm7, %vm304_vm8  ;;  %vm407_vm7 = vcmp.eq.s32.totalorder %v1857_v36, %v1835_v34  ;;  %vm200_vm8 = vcmp.eq.s32.totalorder %v192_v42, %v1835_v34 }
  0xdf   : > { %489 = vperm.xlu1 %1345, %v1670_v19   ;;  %v1881_v10 = vpop.permute.xlu0 %433 }
  0xe1   : > { %v360_v44 = vpop.permute.xlu1 %359 }
  0xe3   : > { %1347 = vset.pattern.permute.xlu1 %v1450_v16 }
  0xe4   : > { %v189_v11 = vpop.permute.xlu0 %188  ;;  %405 = vperm.xlu1 %1347, %v1670_v19  }
  0xe5   : > { %vm199_vm15 = vcmp.eq.s32.totalorder %v189_v11, %v1835_v34 }
  0xe6   : > { %vm203_vm3 = vmor %vm183_vm14, %vm199_vm15  ;;  %v464_v12 = vpop.permute.xlu1 %463 }
  0xe7   : > { %vm223_vm5 = vmor %vm203_vm3, %vm219_vm1  ;;  %vm472_vm12 = vcmp.eq.s32.totalorder %v464_v12, %v1835_v34  ;;  %vm351_vm1 = vcmp.eq.s32.totalorder %v1821_v29, %v1835_v34  ;;  %vm492_vm3 = vcmp.eq.s32.totalorder %v1837_v3, %v1835_v34 }
  0xe8   : > { %v1896_v13 = vpop.permute.xlu0 %197  ;;  %vm243_vm10 = vmor %vm223_vm5, %vm239_vm4  ;;  %vm387_vm4 = vcmp.eq.s32.totalorder %v1839_v15, %v1835_v34 }
  0xe9   : > { %996 = vmatmul.mubr.msk.f32.vlgmr.msra.gmra.mrb[0].mxu0 %vm243_vm10, %v1453_v4  ;;  %vm476_vm0 = vmor %vm456_vm11, %vm472_vm12  ;;  %vm220_vm12 = vcmp.eq.s32.totalorder %v1829_v31, %v1835_v34 }
  0xea   : > { %vm496_vm11 = vmor %vm476_vm0, %vm492_vm3 }
  0xeb   : > { %v316_v16 = vpop.permute.xlu1 %315 }
  0xec   : > { %vm324_vm14 = vcmp.eq.s32.totalorder %v316_v16, %v1835_v34 }
  0xed   : > { %vm328_vm15 = vmor %vm308_vm13, %vm324_vm14  ;;  %v357_v19 = vpop.permute.xlu0 %356 }
  0xee   : > { %vm367_vm2 = vcmp.eq.s32.totalorder %v357_v19, %v1835_v34  ;;  %997 = vmatprep.mubr.msk.f32.mxu0 %vm328_vm15, %v1453_v4  ;;  %vm204_vm13 = vmor %vm184_vm6, %vm200_vm8  ;;  %vm269_vm8 = vcmp.eq.s32.totalorder %v1854_v35, %v1835_v34 }
  0xef   : > { %vm371_vm5 = vmor %vm351_vm1, %vm367_vm2  ;;  %vm352_vm1 = vcmp.eq.s32.totalorder %v1825_v30, %v1835_v34  ;;  %vm368_vm2 = vcmp.eq.s32.totalorder %v360_v44, %v1835_v34 }
  0xf0   : > { %vm391_vm9 = vmor %vm371_vm5, %vm387_vm4  ;;  %v380_v45 = vpop.permute.xlu1 %379 }
  0xf1   : > { %vm411_vm10 = vmor %vm391_vm9, %vm407_vm7  ;;  %vm388_vm0 = vcmp.eq.s32.totalorder %v380_v45, %v1835_v34  ;;  %vm305_vm9 = vcmp.eq.s32.totalorder %v1865_v38, %v1835_v34  ;;  %v366_v17 = vpop.permute.xlu0 %365 }
  0xf2   : > { %1004 = vmatmul.mubr.msk.f32.vlgmr.msra.gmra.mrb[0].mxu1 %vm411_vm10, %v1453_v4  ;;  %vm224_vm14 = vmor %vm204_vm13, %vm220_vm12  ;;  %vm453_vm13 = vcmp.eq.s32.totalorder %v1861_v37, %v1835_v34 }
  0xf3   : > { %1005 = vmatprep.mubr.msk.f32.mxu1 %vm496_vm11, %v1453_v4  ;;  %vm372_vm3 = vmor %vm352_vm1, %vm368_vm2 }
  0xf4   : > { %vm392_vm5 = vmor %vm372_vm3, %vm388_vm0  ;;  %vm409_vm0 = vcmp.eq.s32.totalorder %v1877_v9, %v1835_v34 }
  0xf5   : > { %v232_v46 = vpop.permute.xlu1 %231 }
  0xf6   : > { %vm240_vm15 = vcmp.eq.s32.totalorder %v232_v46, %v1835_v34  ;;  %v322_v20 = vpop.permute.xlu0 %321 }
  0xf7   : > { %vm244_vm4 = vmor %vm224_vm14, %vm240_vm15  ;;  %vm473_vm14 = vcmp.eq.s32.totalorder %v1869_v40, %v1835_v34 }
  0xf8   : > { %998 = vmatmul.mubr.msk.f32.gmra.mrb[2].mxu0 %vm244_vm4, %v1453_v4  ;;  %vm389_vm4 = vcmp.eq.s32.totalorder %v1873_v8, %v1835_v34 }
  0xfa   : > { %v400_v47 = vpop.permute.xlu1 %399 }
  0xfb   : > { %vm408_vm6 = vcmp.eq.s32.totalorder %v400_v47, %v1835_v34  ;;  %v238_v2 = vpop.permute.xlu0 %237 }
  0xfc   : > { %vm412_vm7 = vmor %vm392_vm5, %vm408_vm6 }
  0xfd   : > { %1006 = vmatmul.mubr.msk.f32.gmra.mrb[2].mxu1 %vm412_vm7, %v1453_v4 }
  0xff   : > { %v279_v48 = vpop.permute.xlu1 %278 }
 0x100   : > { %vm285_vm10 = vcmp.eq.s32.totalorder %v279_v48, %v1835_v34 }
 0x101   : > { %vm289_vm11 = vmor %vm269_vm8, %vm285_vm10 }
 0x102   : > { %vm1933_vm12 = vmor %vm289_vm11, %vm305_vm9 }
 0x104   : > { %v431_v50 = vpop.permute.xlu1 %430 }
 0x105   : > { %vm437_vm15 = vcmp.eq.s32.totalorder %v431_v50, %v1835_v34 }
 0x106   : > { %vm457_vm1 = vmor %vm437_vm15, %vm453_vm13 }
 0x107   : > { %vm1942_vm2 = vmor %vm457_vm1, %vm473_vm14 }
 0x109   : > { %v179_v52 = vpop.permute.xlu1 %178 }
 0x10a   : > { %vm185_vm1 = vcmp.eq.s32.totalorder %v179_v52, %v1835_v34 }
 0x10e   : > { %v195_v54 = vpop.permute.xlu1 %194 }
 0x10f   : > { %vm201_vm13 = vcmp.eq.s32.totalorder %v195_v54, %v1835_v34 }
 0x113   : > { %v347_v55 = vpop.permute.xlu1 %346 }
 0x114   : > { %vm353_vm3 = vcmp.eq.s32.totalorder %v347_v55, %v1835_v34 }
 0x118   : > { %v363_v56 = vpop.permute.xlu1 %362 }
 0x119   : > { %vm369_vm5 = vcmp.eq.s32.totalorder %v363_v56, %v1835_v34 }
 0x11a   : > { %vm373_vm6 = vmor %vm353_vm3, %vm369_vm5 }
 0x11b   : > { %vm393_vm7 = vmor %vm373_vm6, %vm389_vm4  ;;  %vm326_vm6 = vcmp.eq.s32.totalorder %v322_v20, %v1835_v34 }
 0x11c   : > { %vm413_vm8 = vmor %vm393_vm7, %vm409_vm0 }
 0x11d   : > { %v215_v57 = vpop.permute.xlu1 %214  ;;  %vm205_vm4 = vmor %vm185_vm1, %vm201_vm13 }
 0x11e   : > { %vm221_vm15 = vcmp.eq.s32.totalorder %v215_v57, %v1835_v34 }
 0x122   : > { %v319_v58 = vpop.permute.xlu1 %318 }
 0x123   : > { %vm325_vm9 = vcmp.eq.s32.totalorder %v319_v58, %v1835_v34 }
 0x124   : > { %vm329_vm10 = vmor %vm1933_vm12, %vm325_vm9 }
 0x125   : > { %999 = vmatprep.mubr.msk.f32.mxu0 %vm329_vm10, %v1453_v4  ;;  %vm225_vm12 = vmor %vm205_vm4, %vm221_vm15 }
 0x127   : > { %v487_v59 = vpop.permute.xlu1 %486 }
 0x128   : > { %vm493_vm11 = vcmp.eq.s32.totalorder %v487_v59, %v1835_v34 }
 0x129   : > { %vm497_vm14 = vmor %vm1942_vm2, %vm493_vm11  ;;  %vm202_vm11 = vcmp.eq.s32.totalorder %v1896_v13, %v1835_v34 }
 0x12a   : > { %1007 = vmatprep.mubr.msk.f32.mxu1 %vm497_vm14, %v1453_v4  ;;  %vm242_vm14 = vcmp.eq.s32.totalorder %v238_v2, %v1835_v34 }
 0x12b   : > { %1008 = vmatmul.mubr.msk.f32.gmra.mrb[4].mxu1 %vm413_vm8, %v1453_v4 }
 0x12c   : > { %v235_v60 = vpop.permute.xlu1 %234 }
 0x12d   : > { %vm241_vm0 = vcmp.eq.s32.totalorder %v235_v60, %v1835_v34 }
 0x12e   : > { %vm245_vm3 = vmor %vm225_vm12, %vm241_vm0  ;;  %vm438_vm0 = vcmp.eq.s32.totalorder %v1881_v10, %v1835_v34 }
 0x12f   : > { %1000 = vmatmul.mubr.msk.f32.gmra.mrb[4].mxu0 %vm245_vm3, %v1453_v4 }
 0x131   : > { %v266_v61 = vpop.permute.xlu1 %265 }
 0x132   : > { %vm270_vm5 = vcmp.eq.s32.totalorder %v266_v61, %v1835_v34 }
 0x136   : > { %v282_v62 = vpop.permute.xlu1 %281 }
 0x137   : > { %vm286_vm2 = vcmp.eq.s32.totalorder %v282_v62, %v1835_v34 }
 0x138   : > { %vm290_vm7 = vmor %vm270_vm5, %vm286_vm2 }
 0x13b   : > { %v450_v63 = vpop.permute.xlu1 %449 }
 0x13c   : > { %vm454_vm3 = vcmp.eq.s32.totalorder %v450_v63, %v1835_v34 }
 0x13d   : > { %vm458_vm5 = vmor %vm438_vm0, %vm454_vm3 }
 0x140   : > { %v182_v18 = vpop.permute.xlu1 %181 }
 0x141   : > { %vm186_vm13 = vcmp.eq.s32.totalorder %v182_v18, %v1835_v34 }
 0x142   : > { %vm206_vm15 = vmor %vm186_vm13, %vm202_vm11 }
 0x145   : > { %v302_v21 = vpop.permute.xlu1 %301 }
 0x146   : > { %vm306_vm8 = vcmp.eq.s32.totalorder %v302_v21, %v1835_v34 }
 0x147   : > { %vm310_vm9 = vmor %vm290_vm7, %vm306_vm8  ;;  %vm370_vm8 = vcmp.eq.s32.totalorder %v366_v17, %v1835_v34 }
 0x148   : > { %vm330_vm10 = vmor %vm310_vm9, %vm326_vm6 }
 0x149   : > { %1001 = vmatprep.mubr.msk.f32.mxu0 %vm330_vm10, %v1453_v4 }
 0x14a   : > { %v350_v22 = vpop.permute.xlu1 %349 }
 0x14b   : > { %vm354_vm9 = vcmp.eq.s32.totalorder %v350_v22, %v1835_v34 }
 0x14c   : > { %vm374_vm13 = vmor %vm354_vm9, %vm370_vm8 }
 0x14f   : > { %v470_v23 = vpop.permute.xlu1 %469 }
 0x150   : > { %vm474_vm2 = vcmp.eq.s32.totalorder %v470_v23, %v1835_v34 }
 0x151   : > { %vm478_vm6 = vmor %vm458_vm5, %vm474_vm2 }
 0x154   : > { %v218_v7 = vpop.permute.xlu1 %217 }
 0x155   : > { %vm222_vm1 = vcmp.eq.s32.totalorder %v218_v7, %v1835_v34 }
 0x156   : > { %vm226_vm4 = vmor %vm206_vm15, %vm222_vm1 }
 0x157   : > { %vm246_vm12 = vmor %vm226_vm4, %vm242_vm14 }
 0x158   : > { %1002 = vmatmul.mubr.msk.f32.gmra.mrb[6].mxu0 %vm246_vm12, %v1453_v4 }
 0x159   : > { %v386_v0 = vpop.permute.xlu1 %385 }
 0x15a   : > { %vm390_vm11 = vcmp.eq.s32.totalorder %v386_v0, %v1835_v34 }
 0x15b   : > { %vm394_vm14 = vmor %vm374_vm13, %vm390_vm11 }
 0x15e   : > { %v490_v24 = vpop.permute.xlu1 %489 }
 0x15f   : > { %vm494_vm7 = vcmp.eq.s32.totalorder %v490_v24, %v1835_v34 }
 0x160   : > { %vm498_vm10 = vmor %vm478_vm6, %vm494_vm7 }
 0x161   : > { %1009 = vmatprep.mubr.msk.f32.mxu1 %vm498_vm10, %v1453_v4 }
 0x163   : > { %v406_v53 = vpop.permute.xlu1 %405 }
 0x164   : > { %vm410_vm15 = vcmp.eq.s32.totalorder %v406_v53, %v1835_v34 }
 0x165   : > { %vm414_vm1 = vmor %vm394_vm14, %vm410_vm15 }
 0x166   : > { %1010 = vmatmul.mubr.msk.f32.gmra.mrb[6].mxu1 %vm414_vm1, %v1453_v4 }
 0x1bc   : > { %v1063_v25 = vpop.f32.mrb[0].mxu0 }
 0x1bd   : > { %v1064_v26 = vpop.f32.mrb[1].mxu0 }
 0x1be   : > { %v1065_v27 = vadd.f32 %v1064_v26, %v1063_v25 }
 0x1c5   : > { %v1107_v28 = vpop.f32.mrb[0].mxu1 }
 0x1c6   : > { %v1108_v29 = vpop.f32.mrb[1].mxu1 }
 0x1c7   : > { %v1109_v30 = vadd.f32 %v1108_v29, %v1107_v28 }
 0x1c9   : > { %v723_v1 = vadd.f32 %v1109_v30, %v1065_v27 }
 0x1cb   : > { %741 = vst [vmem:[%s1989_s3] sm:$0xff] %v723_v1  ;;  %v1066_v31 = vpop.f32.mrb[2].mxu0 }
 0x1cc   : > { %v1067_v32 = vpop.f32.mrb[3].mxu0 }
 0x1cd   : > { %v1068_v33 = vadd.f32 %v1067_v32, %v1066_v31 }
 0x1d0   : > { %v1110_v34 = vpop.f32.mrb[2].mxu1 }
 0x1d1   : > { %v1111_v3 = vpop.f32.mrb[3].mxu1 }
 0x1d2   : > { %v1112_v15 = vadd.f32 %v1111_v3, %v1110_v34 }
 0x1d4   : > { %v728_v5 = vadd.f32 %v1112_v15, %v1068_v33 }
 0x1d6   : > { %742 = vst [vmem:[%s1989_s3 + $0x8] sm:$0xff] %v728_v5 }
 0x1fe   : > { %v1113_v14 = vpop.f32.mrb[4].mxu1 }
 0x1ff   : > { %v1114_v4 = vpop.f32.mrb[5].mxu1 }
 0x200   : > { %v1115_v35 = vadd.f32 %v1114_v4, %v1113_v14 }
 0x202   : > { %v1069_v36 = vpop.f32.mrb[4].mxu0 }
 0x203   : > { %v1070_v37 = vpop.f32.mrb[5].mxu0 }
 0x204   : > { %v1071_v6 = vadd.f32 %v1070_v37, %v1069_v36 }
 0x206   : > { %v733_v38 = vadd.f32 %v1115_v35, %v1071_v6 }
 0x208   : > { %743 = vst [vmem:[%s1989_s3 + $0x10] sm:$0xff] %v733_v38 }
 0x22b   : > { %v1072_v39 = vpop.f32.mrb[6].mxu0 }
 0x22c   : > { %v1073_v40 = vpop.f32.mrb[7].mxu0 }
 0x22d   : > { %v1074_v41 = vadd.f32 %v1073_v40, %v1072_v39 }
 0x239   : > { %v1116_v8 = vpop.f32.mrb[6].mxu1  ;;  %751 = sbr.rel (!%p1494_p4) target bundleno = 625 (0x271), region = 32 }
 0x23a   : > { %v1117_v42 = vpop.f32.mrb[7].mxu1 }
 0x23b   : > { %v1118_v9 = vadd.f32 %v1117_v42, %v1116_v8 }
 0x23d   : > { %v738_v43 = vadd.f32 %v1118_v9, %v1074_v41 }
 0x23f   : > { %744 = vst [vmem:[%s1989_s3 + $0x18] sm:$0xff] %v738_v43 }
 0x240   : > { %s2066_s9 = smov (!%p754_p8, %s753_s9), 4 }
 0x241   : > { %s1013_s7 = sshll.u32 %s2066_s9, 7 }
 0x242   : > { %p1016_p9 = scmp.eq.s32.totalorder %s1013_s7, 0 }
 0x243   : > { %s2008_s8 = sshrl.u32 (!%p1016_p9), %s2066_s9, 2 }
 0x244   : > { %762 = sbr.rel (%p1016_p9) target bundleno = 625 (0x271), region = 36  ;;  %p1017_p10 = scmp.le.s32.totalorder (!%p1016_p9), %s2008_s8, 0 }
 0x24b   : > { %928 = sbr.rel (%p1017_p10) target bundleno = 604 (0x25c), region = 112  ;;  %s2059_s12 = smov (!%p1017_p10), %s2002_s23 }
 0x24c   : > { %s2060_s17 = smov (!%p1017_p10), %s1989_s3  ;;  %s2017_s18 = smov (!%p1017_p10), 0  }
 0x24d   : > { %s1417_s11 = smov (!%p1017_p10), 0  }
 0x252 LB: >> { %v830_v10 = vld [vmem:[%s1411_s17] sm:$0xff]  ;;  %v832_v44 = vld [vmem:[%s1411_s17 + $0x8] sm:$0xff]  ;;  %v834_v11 = vld [vmem:[%s1411_s17 + $0x10] sm:$0xff]  ;;  %s838_s14 = sadd.s32 1, %s1415_s18  ;;  %s824_s11 = sadd.s32 1, %s1419_s11   ;;  %s1419_s11 = sphi %s1417_s11, %s824_s11   ;;  %s1415_s18 = sphi %s2017_s18, %s2061_s18   ;;  %s1411_s17 = sphi %s2060_s17, %s843_s17   ;;  %s1407_s12 = sphi %s2059_s12, %s844_s12  }
 0x253   : >> { %831 = vst [vmem:[%s1407_s12] sm:$0xff] %v830_v10  ;;  %833 = vst [vmem:[%s1407_s12 + $0x8] sm:$0xff] %v832_v44  ;;  %v836_v12 = vld [vmem:[%s1411_s17 + $0x18] sm:$0xff]  ;;  %p839_p11 = scmp.ge.s32.totalorder %s838_s14, %s2008_s8  ;;  %p823_p12 = scmp.ge.s32.totalorder %s824_s11, %s2008_s8 }
 0x254   : >> { %835 = vst [vmem:[%s1407_s12 + $0x10] sm:$0xff] %v834_v11  ;;  %837 = vst [vmem:[%s1407_s12 + $0x18] sm:$0xff] %v836_v12 }
 0x255   : >> { %s2068_s14 = smov (%p839_p11, %s838_s14), 0  ;;  %826 = sbr.rel (!%p823_p12) target bundleno = 594 (0x252), region = 118 }
 0x256   : >> { %s1018_s15 = sshll.u32 %s2068_s14, 5  ;;  %s2061_s18 = smov %s2068_s14 }
 0x257   : >> { %s843_s17 = scalar_lea.vmem %s1989_s3, %s1018_s15 [#allocation2]   ;;  %s844_s12 = scalar_lea.vmem %s2002_s23, %s1018_s15  }
 0x25c PF: > { %s2033_s19 = sand.u32 3, %s2066_s9   ;;  %s1029_s20 = sshll.u32 %s2008_s8, 5 }
 0x25d   : > { %s849_s21 = scalar_lea.vmem %s1989_s3, %s1029_s20 [#allocation2]   ;;  %s851_s22 = scalar_lea.vmem %s2002_s23, %s1029_s20  }
 0x25e   : > { %p1023_p13 = scmp.le.s32.totalorder %s2033_s19, 0 }
 0x25f   : > { %s1421_s24 = smov (!%p1023_p13), %s851_s22   ;;  %s1425_s25 = smov (!%p1023_p13), %s849_s21  }
 0x260   : > { %942 = sbr.rel (%p1023_p13) target bundleno = 625 (0x271), region = 123  ;;  %s1429_s26 = smov (!%p1023_p13), 0  }
 0x261   : > { %s1433_s27 = smov (!%p1023_p13), 0  }
 0x267 LB: >> { %v861_v13 = vld [vmem:[%s1427_s25] sm:$0xff]  ;;  %s863_s28 = sadd.s32 1, %s1431_s26  ;;  %s855_s27 = sadd.s32 1, %s1435_s27   ;;  %s1435_s27 = sphi %s1433_s27, %s855_s27   ;;  %s1431_s26 = sphi %s1429_s26, %s1430_s26   ;;  %s1427_s25 = sphi %s1425_s25, %s868_s25   ;;  %s1423_s24 = sphi %s1421_s24, %s869_s24  }
 0x268   : >> { %862 = vst [vmem:[%s1423_s24] sm:$0xff] %v861_v13  ;;  %p864_p0 = scmp.ge.s32.totalorder %s863_s28, %s2033_s19  ;;  %p854_p1 = scmp.ge.s32.totalorder %s855_s27, %s2033_s19 }
 0x26a   : >> { %s2070_s28 = smov (%p864_p0, %s863_s28), 0  ;;  %857 = sbr.rel (!%p854_p1) target bundleno = 615 (0x267), region = 129 }
 0x26b   : >> { %s1024_s29 = sshll.u32 %s2070_s28, 3  ;;  %s1430_s26 = smov %s2070_s28  }
 0x26c   : >> { %s868_s25 = scalar_lea.vmem %s849_s21, %s1024_s29 [#allocation2]   ;;  %s869_s24 = scalar_lea.vmem %s851_s22, %s1024_s29  }
 0x271 PF: > { %p9_p2 = scmp.ge.s32.totalorder %s1484_s13, 4   ;;  %s2062_s9 = smov %s1399_s10 }
 0x272   : > { %s2063_s10 = smov %s1492_s16  ;;  %s2064_s11 = smov %s1484_s13 }
 0x273   :  { %11 = sbr.rel (!%p9_p2) target bundleno = 2 (0x2), region = 140 }

</bundles_post_ra>
